<compile_context>
chip_gen: v6e
topology: v6e:2x2x1
jax: 0.10.0
libtpu: 0.0.40
codegen_flags: <defaults>
</compile_context>

<pallas_src>
import jax
import jax.numpy as jnp
from jax.experimental import pallas as pl
from jax.experimental.pallas import tpu as pltpu

IN_DIM = 28 * 28        # 784
HID_DIM = 32
NUM_CLASSES = 10
TB_MAX = 2048           # row tile: 2048x784 bf16 = 3.2 MB per buffer; 2 input
                        # buffers + resident weights fit the 32 MiB scoped-VMEM
                        # default on v5e/v6e and v7x's smaller 64 MiB VMEM.


def _round_up(n, m):
    return (n + m - 1) // m * m


def _softplus(x):
    # PyTorch Softplus(beta=1, threshold=20): x when x > 20, else log1p(exp(x)).
    return jnp.where(x > 20.0, x, jnp.log1p(jnp.exp(jnp.minimum(x, 20.0))))


def _mlp_kernel(x_ref, w1_ref, b1_ref, w2_ref, b2_ref, o_ref):
    # Layer 1: (TB, 784) bf16 @ (784, 32) bf16 -> f32 accumulation on the MXU.
    h = jnp.dot(x_ref[...], w1_ref[...], preferred_element_type=jnp.float32)
    h = _softplus(h + b1_ref[...])                       # bias + softplus in f32
    # Layer 2: (TB, 32) bf16 @ (32, 10) bf16 -> f32.
    o = jnp.dot(h.astype(jnp.bfloat16), w2_ref[...],
                preferred_element_type=jnp.float32)
    o_ref[...] = o + b2_ref[...]


def _build_call(B_pad, tb):
    grid = (B_pad // tb,)
    cost = pl.CostEstimate(
        flops=2 * B_pad * IN_DIM * HID_DIM + 2 * B_pad * HID_DIM * NUM_CLASSES,
        transcendentals=2 * B_pad * HID_DIM,             # exp + log1p per hidden
        bytes_accessed=(B_pad * IN_DIM * 2               # x (bf16)
                        + B_pad * NUM_CLASSES * 4        # logits (f32)
                        + IN_DIM * HID_DIM * 2           # W1 (bf16)
                        + HID_DIM * NUM_CLASSES * 2      # W2 (bf16)
                        + HID_DIM * 4 + NUM_CLASSES * 4))
    return pl.pallas_call(
        _mlp_kernel,
        out_shape=jax.ShapeDtypeStruct((B_pad, NUM_CLASSES), jnp.float32),
        grid_spec=pltpu.PrefetchScalarGridSpec(
            num_scalar_prefetch=0,
            grid=grid,
            in_specs=[
                pl.BlockSpec((tb, IN_DIM), lambda i: (i, 0)),            # x tile
                pl.BlockSpec((IN_DIM, HID_DIM), lambda i: (0, 0)),       # W1 (resident)
                pl.BlockSpec((1, HID_DIM), lambda i: (0, 0)),            # b1 (resident)
                pl.BlockSpec((HID_DIM, NUM_CLASSES), lambda i: (0, 0)),  # W2 (resident)
                pl.BlockSpec((1, NUM_CLASSES), lambda i: (0, 0)),        # b2 (resident)
            ],
            out_specs=pl.BlockSpec((tb, NUM_CLASSES), lambda i: (i, 0)),
        ),
        compiler_params=pltpu.CompilerParams(
            dimension_semantics=("parallel",)),   # both TCs on v7x; no-op v5e/v6e
        cost_estimate=cost,
    )


def feedforward_mnist_classifier(x_nchw, w1, b1, w2, b2):
    """x_nchw: (B, 1, 28, 28) float32 -> logits (B, 10) float32."""
    B = x_nchw.shape[0]
    # Row-major flatten, exactly like torch `x.view(-1, 784)`, then bf16 for the
    # HBM-bound activation stream (matmuls still accumulate in f32).
    x2d = x_nchw.reshape(B, IN_DIM).astype(jnp.bfloat16)

    # Row tile: multiple of 16 (bf16 sublane packing), capped at TB_MAX.
    tb = min(TB_MAX, _round_up(B, 16))
    B_pad = _round_up(B, tb)
    if B_pad != B:
        x2d = jnp.pad(x2d, ((0, B_pad - B), (0, 0)))     # tail rows masked off below

    out = _build_call(B_pad, tb)(
        x2d,
        w1.astype(jnp.bfloat16), b1.astype(jnp.float32),
        w2.astype(jnp.bfloat16), b2.astype(jnp.float32))
    return out[:B]


def init_params(key):
    """Deterministic init matching nn.Linear shapes (stored transposed: W is
    (in, out) so the kernel computes x @ W)."""
    k1, k2, k3, k4 = jax.random.split(key, 4)
    s1 = 1.0 / jnp.sqrt(IN_DIM)
    s2 = 1.0 / jnp.sqrt(HID_DIM)
    w1 = jax.random.uniform(k1, (IN_DIM, HID_DIM), jnp.float32, -s1, s1)
    b1 = jax.random.uniform(k2, (1, HID_DIM), jnp.float32, -s1, s1)
    w2 = jax.random.uniform(k3, (HID_DIM, NUM_CLASSES), jnp.float32, -s2, s2)
    b2 = jax.random.uniform(k4, (1, NUM_CLASSES), jnp.float32, -s2, s2)
    return w1, b1, w2, b2


if __name__ == "__main__":
    key = jax.random.PRNGKey(0)
    kx, kp = jax.random.split(key)

    B = 8
    x = jax.random.normal(kx, (B, 1, 28, 28), jnp.float32)
    w1, b1, w2, b2 = init_params(kp)

    fwd = jax.jit(feedforward_mnist_classifier)
    logits = jax.block_until_ready(fwd(x, w1, b1, w2, b2))
    assert logits.shape == (B, NUM_CLASSES)

    # Reference mirroring the kernel's bf16-input / f32-accumulate matmuls.
    x2d = x.reshape(B, IN_DIM)
    xb = x2d.astype(jnp.bfloat16).astype(jnp.float32)
    w1b = w1.astype(jnp.bfloat16).astype(jnp.float32)
    w2b = w2.astype(jnp.bfloat16).astype(jnp.float32)
    h_ref = jax.nn.softplus(xb @ w1b + b1)
    ref = h_ref.astype(jnp.bfloat16).astype(jnp.float32) @ w2b + b2
    assert jnp.allclose(logits, ref, atol=5e-3, rtol=5e-3), (
        float(jnp.max(jnp.abs(logits - ref))))

    # Looser sanity check against the full-f32 PyTorch-equivalent math.
    ref_f32 = jax.nn.softplus(x2d @ w1 + b1) @ w2 + b2
    assert jnp.allclose(logits, ref_f32, atol=5e-2, rtol=5e-2), (
        float(jnp.max(jnp.abs(logits - ref_f32))))

    print("KERNEL_OK")
</pallas_src>

<mosaic_0001>
module attributes {stable_mosaic.version = 11 : i64} {
  func.func @_mlp_kernel(%arg0: i32, %arg1: memref<16x784xbf16, #tpu.memory_space<vmem>>, %arg2: memref<784x32xbf16, #tpu.memory_space<vmem>>, %arg3: memref<1x32xf32, #tpu.memory_space<vmem>>, %arg4: memref<32x10xbf16, #tpu.memory_space<vmem>>, %arg5: memref<1x10xf32, #tpu.memory_space<vmem>>, %arg6: memref<16x10xf32, #tpu.memory_space<vmem>>) attributes {dimension_semantics = [#tpu.dimension_semantics<parallel>], iteration_bounds = array<i64: 1>, scalar_prefetch = 0 : i64, scratch_operands = 0 : i64, tpu.core_type = #tpu.core_type<tc>, window_params = [{transform_indices = @transform_0, window_bounds = array<i64: 16, 784>}, {pipeline_mode = #tpu.pipeline_mode<synchronous>, transform_indices = @transform_1, window_bounds = array<i64: 784, 32>}, {pipeline_mode = #tpu.pipeline_mode<synchronous>, transform_indices = @transform_2, window_bounds = array<i64: 1, 32>}, {pipeline_mode = #tpu.pipeline_mode<synchronous>, transform_indices = @transform_3, window_bounds = array<i64: 32, 10>}, {pipeline_mode = #tpu.pipeline_mode<synchronous>, transform_indices = @transform_4, window_bounds = array<i64: 1, 10>}, {transform_indices = @transform_5, window_bounds = array<i64: 16, 10>}]} {
    %c0 = arith.constant 0 : index
    %c0_0 = arith.constant 0 : index
    %0 = vector.load %arg1[%c0, %c0_0] : memref<16x784xbf16, #tpu.memory_space<vmem>>, vector<16x784xbf16>
    %c0_1 = arith.constant 0 : index
    %c0_2 = arith.constant 0 : index
    %1 = vector.load %arg2[%c0_1, %c0_2] : memref<784x32xbf16, #tpu.memory_space<vmem>>, vector<784x32xbf16>
    %cst = arith.constant dense<0.000000e+00> : vector<16x32xf32>
    %2 = tpu.matmul %0, %1, %cst {dimension_numbers = #tpu.dot_dimension_numbers<[1], [0], [0], [1], [0, 0, 1, 1], [], []>} : vector<16x784xbf16>, vector<784x32xbf16>, vector<16x32xf32> -> vector<16x32xf32>
    %c0_3 = arith.constant 0 : index
    %c0_4 = arith.constant 0 : index
    %3 = vector.load %arg3[%c0_3, %c0_4] : memref<1x32xf32, #tpu.memory_space<vmem>>, vector<1x32xf32>
    %4 = vector.broadcast %3 : vector<1x32xf32> to vector<16x32xf32>
    %5 = arith.addf %2, %4 : vector<16x32xf32>
    %cst_5 = arith.constant 2.000000e+01 : f32
    %6 = vector.broadcast %cst_5 : f32 to vector<16x32xf32>
    %7 = arith.cmpf ogt, %5, %6 : vector<16x32xf32>
    %cst_6 = arith.constant 2.000000e+01 : f32
    %8 = vector.broadcast %cst_6 : f32 to vector<16x32xf32>
    %9 = arith.minimumf %5, %8 : vector<16x32xf32>
    %10 = math.exp %9 : vector<16x32xf32>
    %11 = math.log1p %10 : vector<16x32xf32>
    %12 = arith.select %7, %5, %11 : vector<16x32xi1>, vector<16x32xf32>
    %13 = arith.truncf %12 : vector<16x32xf32> to vector<16x32xbf16>
    %c0_7 = arith.constant 0 : index
    %c0_8 = arith.constant 0 : index
    %14 = vector.load %arg4[%c0_7, %c0_8] : memref<32x10xbf16, #tpu.memory_space<vmem>>, vector<32x10xbf16>
    %cst_9 = arith.constant dense<0.000000e+00> : vector<16x10xf32>
    %15 = tpu.matmul %13, %14, %cst_9 {dimension_numbers = #tpu.dot_dimension_numbers<[1], [0], [0], [1], [0, 0, 1, 1], [], []>} : vector<16x32xbf16>, vector<32x10xbf16>, vector<16x10xf32> -> vector<16x10xf32>
    %c0_10 = arith.constant 0 : index
    %c0_11 = arith.constant 0 : index
    %16 = vector.load %arg5[%c0_10, %c0_11] : memref<1x10xf32, #tpu.memory_space<vmem>>, vector<1x10xf32>
    %17 = vector.broadcast %16 : vector<1x10xf32> to vector<16x10xf32>
    %18 = arith.addf %15, %17 : vector<16x10xf32>
    %c0_12 = arith.constant 0 : index
    %c0_13 = arith.constant 0 : index
    %19 = vector.load %arg6[%c0_12, %c0_13] : memref<16x10xf32, #tpu.memory_space<vmem>>, vector<16x10xf32>
    tpu.vector_store %arg6[%c0_12, %c0_13], %18 {strides = array<i32>} : memref<16x10xf32, #tpu.memory_space<vmem>>, vector<16x10xf32>,
    return
  }
  func.func @transform_0(%arg0: i32) -> (i32, i32) {
    %c0_i32 = arith.constant 0 : i32
    %c0_i32_0 = arith.constant 0 : i32
    return %arg0, %c0_i32 : i32, i32
  }
  func.func @transform_1(%arg0: i32) -> (i32, i32) {
    %c0_i32 = arith.constant 0 : i32
    %c0_i32_0 = arith.constant 0 : i32
    %c0_i32_1 = arith.constant 0 : i32
    return %c0_i32, %c0_i32_0 : i32, i32
  }
  func.func @transform_2(%arg0: i32) -> (i32, i32) {
    %c0_i32 = arith.constant 0 : i32
    %c0_i32_0 = arith.constant 0 : i32
    %c0_i32_1 = arith.constant 0 : i32
    return %c0_i32, %c0_i32_0 : i32, i32
  }
  func.func @transform_3(%arg0: i32) -> (i32, i32) {
    %c0_i32 = arith.constant 0 : i32
    %c0_i32_0 = arith.constant 0 : i32
    %c0_i32_1 = arith.constant 0 : i32
    return %c0_i32, %c0_i32_0 : i32, i32
  }
  func.func @transform_4(%arg0: i32) -> (i32, i32) {
    %c0_i32 = arith.constant 0 : i32
    %c0_i32_0 = arith.constant 0 : i32
    %c0_i32_1 = arith.constant 0 : i32
    return %c0_i32, %c0_i32_0 : i32, i32
  }
  func.func @transform_5(%arg0: i32) -> (i32, i32) {
    %c0_i32 = arith.constant 0 : i32
    %c0_i32_0 = arith.constant 0 : i32
    return %arg0, %c0_i32 : i32, i32
  }
}

</mosaic_0001>

<bundles_post_ra>
// kernel: feedforward_mnist_classifier.1
= control target key start
LH: loop header
LB: loop body
LE: loop exit
PB: predicated region body
PF: predicated region fallthrough
CT: control target
= control target key end

     0   :  { %v953_v38 = vmov 0.0   ;;  %vm954_vm0 = vmmov 0   ;;  %vm463_vm1 = vcmask 130048   ;;  %vm683_vm6 = vcmask 261120   ;;  %s1173_s1 = inlined_call_operand.vmem [shape: bf16[784,32], index: 1, kind: input, shape index: {}]   ;;  %s1174_s0 = inlined_call_operand.vmem [shape: bf16[16,784], index: 0, kind: input, shape index: {}]   ;;  %s1175_s3 = inlined_call_operand.vmem [shape: bf16[32,10], index: 3, kind: input, shape index: {}]   ;;  %s1176_s2 = inlined_call_operand.vmem [shape: f32[1,32], index: 2, kind: input, shape index: {}]   ;;  %s1177_s4 = inlined_call_operand.vmem [shape: f32[1,10], index: 4, kind: input, shape index: {}]   ;;  %s1178_s5 = inlined_call_operand.vmem [shape: f32[16,10], index: 5, kind: output, shape index: {}]  }
   0x1   :  { %v884_v0 = vld [vmem:[%s1173_s1 + $0x78] sm:$0xff]   ;;  %v888_v4 = vld [vmem:[%s1173_s1 + $0x70] sm:$0xff]   ;;  %v892_v8 = vld [vmem:[%s1173_s1 + $0x68] sm:$0xff]   ;;  %vm728_vm7 = vcmask 80896  }
   0x2   :  { %v885_v1 = vld [vmem:[%s1173_s1 + $0x38] sm:$0xff]   ;;  %797 = vmatprep.subr.bf16.mxu0 %v884_v0  ;;  %v889_v5 = vld [vmem:[%s1173_s1 + $0x30] sm:$0xff]   ;;  %v893_v9 = vld [vmem:[%s1173_s1 + $0x28] sm:$0xff]  }
   0x3   :  { %v886_v2 = vld [vmem:[%s1173_s1 + $0xf8] sm:$0xff]   ;;  %798 = vmatpush3.bf16.msra.mxu0 %v885_v1  ;;  %v890_v6 = vld [vmem:[%s1173_s1 + $0xf0] sm:$0xff]   ;;  %v894_v10 = vld [vmem:[%s1173_s1 + $0xe8] sm:$0xff]  }
   0x4   :  { %v887_v3 = vld [vmem:[%s1173_s1 + $0xb8] sm:$0xff]   ;;  %819 = vmatprep.subr.bf16.mxu1 %v886_v2  ;;  %799 = vmatprep.subr.bf16.mxu0 %v888_v4  ;;  %v891_v7 = vld [vmem:[%s1173_s1 + $0xb0] sm:$0xff]   ;;  %v895_v11 = vld [vmem:[%s1173_s1 + $0xa8] sm:$0xff]  }
   0x5   :  { %820 = vmatpush3.bf16.msra.mxu1 %v887_v3  ;;  %v896_v12 = vld [vmem:[%s1173_s1 + $0x60] sm:$0xff]   ;;  %v900_v16 = vld [vmem:[%s1173_s1 + $0x58] sm:$0xff]   ;;  %v904_v20 = vld [vmem:[%s1173_s1 + $0x50] sm:$0xff]  }
   0x6   :  { %821 = vmatprep.subr.bf16.mxu1 %v890_v6  ;;  %v897_v13 = vld [vmem:[%s1173_s1 + $0x20] sm:$0xff]   ;;  %v901_v17 = vld [vmem:[%s1173_s1 + $0x18] sm:$0xff]   ;;  %v905_v21 = vld [vmem:[%s1173_s1 + $0x10] sm:$0xff]  }
   0x7   :  { %800 = vmatpush3.bf16.msra.mxu0 %v889_v5  ;;  %v898_v14 = vld [vmem:[%s1173_s1 + $0xe0] sm:$0xff]   ;;  %v902_v18 = vld [vmem:[%s1173_s1 + $0xd8] sm:$0xff]   ;;  %v906_v22 = vld [vmem:[%s1173_s1 + $0xd0] sm:$0xff]  }
   0x8   :  { %801 = vmatprep.subr.bf16.mxu0 %v892_v8  ;;  %v899_v15 = vld [vmem:[%s1173_s1 + $0xa0] sm:$0xff]   ;;  %v903_v19 = vld [vmem:[%s1173_s1 + $0x98] sm:$0xff]   ;;  %v907_v23 = vld [vmem:[%s1173_s1 + $0x90] sm:$0xff]  }
   0x9   :  { %822 = vmatpush3.bf16.msra.mxu1 %v891_v7  ;;  %v908_v24 = vld [vmem:[%s1173_s1 + $0x48] sm:$0xff]   ;;  %v912_v28 = vld [vmem:[%s1173_s1 + $0x40] sm:$0xff]   ;;  %v919_v34 = vld [vmem:[%s1173_s1 + $0x178] sm:$0xff]  }
   0xa   :  { %823 = vmatprep.subr.bf16.mxu1 %v894_v10  ;;  %v909_v25 = vld [vmem:[%s1173_s1 + $0x8] sm:$0xff]   ;;  %v913_v29 = vld [vmem:[%s1173_s1] sm:$0xff]   ;;  %v923_v37 = vld [vmem:[%s1173_s1 + $0x138] sm:$0xff]  }
   0xb   :  { %802 = vmatpush3.bf16.msra.mxu0 %v893_v9  ;;  %v910_v26 = vld [vmem:[%s1173_s1 + $0xc8] sm:$0xff]   ;;  %v914_v30 = vld [vmem:[%s1173_s1 + $0xc0] sm:$0xff]   ;;  %v924_v39 = vld [vmem:[%s1173_s1 + $0x170] sm:$0xff]  }
   0xc   :  { %803 = vmatprep.subr.bf16.mxu0 %v896_v12  ;;  %v911_v27 = vld [vmem:[%s1173_s1 + $0x88] sm:$0xff]   ;;  %v915_v31 = vld [vmem:[%s1174_s0] ss:$28 sps:$4 sm:$0xff]   ;;  %v925_v40 = vld [vmem:[%s1173_s1 + $0x130] sm:$0xff]  }
   0xd   :  { %824 = vmatpush3.bf16.msra.mxu1 %v895_v11  ;;  %v917_v32 = vld [vmem:[%s1174_s0 + $0x4] ss:$28 sps:$4 sm:$0xff]   ;;  %v922_v36 = vld [vmem:[%s1174_s0 + $0xc] ss:$28 sps:$4 sm:$0xff]   ;;  %v930_v45 = vld [vmem:[%s1173_s1 + $0x158] sm:$0xff]  }
   0xe   :  { %825 = vmatprep.subr.bf16.mxu1 %v898_v14  ;;  %v918_v33 = vld [vmem:[%s1173_s1 + $0x80] sm:$0xff]   ;;  %499 = vmatprep.mubr.bf16.mxu0 %v917_v32  ;;  %v926_v41 = vld [vmem:[%s1173_s1 + $0x168] sm:$0xff]   ;;  %v931_v46 = vld [vmem:[%s1173_s1 + $0x118] sm:$0xff]  }
   0xf   :  { %804 = vmatpush3.bf16.msra.mxu0 %v897_v13  ;;  %v920_v35 = vld [vmem:[%s1174_s0 + $0x8] ss:$28 sps:$4 sm:$0xff]   ;;  %540 = vmatprep.mubr.bf16.mxu1 %v922_v36  ;;  %v932_v47 = vld [vmem:[%s1173_s1 + $0x150] sm:$0xff]   ;;  %v735_v7 = vld [vmem:[%s1176_s2] ss:$0 sm:$0xff] }
  0x10   :  { %805 = vmatprep.subr.bf16.mxu0 %v900_v16  ;;  %v927_v42 = vld [vmem:[%s1173_s1 + $0x128] sm:$0xff]   ;;  %v928_v43 = vld [vmem:[%s1173_s1 + $0x160] sm:$0xff]   ;;  %v941_v49 = vld [vmem:[%s1174_s0 + $0x14] ss:$28 sps:$4 sm:$0xff]  }
  0x11   :  { %826 = vmatpush3.bf16.msra.mxu1 %v899_v15  ;;  %v929_v44 = vld [vmem:[%s1173_s1 + $0x120] sm:$0xff]   ;;  %v942_v50 = vld [vmem:[%s1174_s0 + $0x18] ss:$28 sps:$4 sm:$0xff]   ;;  %v934_v52 = vld [vmem:[%s1173_s1 + $0x148] sm:$0xff]  }
  0x12   :  { %827 = vmatprep.subr.bf16.mxu1 %v902_v18  ;;  %v938_v48 = vld [vmem:[%s1173_s1 + $0x180] sm:$0xff]   ;;  %v933_v51 = vld [vmem:[%s1173_s1 + $0x110] sm:$0xff]   ;;  %v935_v53 = vld [vmem:[%s1173_s1 + $0x108] sm:$0xff]  }
  0x13   :  { %806 = vmatpush3.bf16.msra.mxu0 %v901_v17  ;;  %v936_v54 = vld [vmem:[%s1173_s1 + $0x140] sm:$0xff]   ;;  %v939_v56 = vld [vmem:[%s1174_s0 + $0x10] ss:$28 sps:$4 sm:$0xff]  }
  0x14   :  { %807 = vmatprep.subr.bf16.mxu0 %v904_v20  ;;  %v937_v55 = vld [vmem:[%s1173_s1 + $0x100] sm:$0xff]   ;;  %v943_v57 = vld [vmem:[%s1175_s3 + $0x8] sm:$0xff]  }
  0x15   :  { %828 = vmatpush3.bf16.msra.mxu1 %v903_v19  ;;  %v944_v58 = vld [vmem:[%s1175_s3] sm:$0xff]  }
  0x16   :  { %829 = vmatprep.subr.bf16.mxu1 %v906_v22 }
  0x17   :  { %808 = vmatpush3.bf16.msra.mxu0 %v905_v21 }
  0x18   :  { %809 = vmatprep.subr.bf16.mxu0 %v908_v24 }
  0x19   :  { %830 = vmatpush3.bf16.msra.mxu1 %v907_v23 }
  0x1a   :  { %831 = vmatprep.subr.bf16.mxu1 %v910_v26 }
  0x1b   :  { %810 = vmatpush3.bf16.msra.mxu0 %v909_v25 }
  0x1c   :  { %811 = vmatprep.subr.bf16.mxu0 %v912_v28 }
  0x1d   :  { %832 = vmatpush3.bf16.msra.mxu1 %v911_v27 }
  0x1e   :  { %833 = vmatprep.subr.bf16.mxu1 %v914_v30 }
  0x1f   :  { %812 = vmatpush3.bf16.msra.mxu0 %v913_v29 }
  0x20   :  { %841 = vmatprep.subr.bf16.mxu0 %v919_v34 }
  0x21   :  { %834 = vmatpush3.bf16.msra.mxu1 %v918_v33 }
  0x22   :  { %500 = vmatmul.mubr.bf16.vlgmr.msra.gmra.mxu0 %v915_v31  ;;  %868 = vmatprep.subr.bf16.mxu1 %v953_v38 }
  0x23   :  { %842 = vmatpush3.bf16.msra.mxu0 %v923_v37  ;;  %581 = vmatprep.mubr.bf16.mxu0 %v941_v49 }
  0x24   :  { %541 = vmatmul.mubr.bf16.vlgmr.msra.gmra.mxu1 %v920_v35  ;;  %843 = vmatprep.subr.bf16.mxu0 %v924_v39 }
  0x25   :  { %870 = vmatprep.mubr.msk.bf16.mxu1 %vm954_vm0, %v953_v38  ;;  %869 = vmatpush3.bf16.msra.mxu1 %v938_v48 }
  0x26   :  { %874 = vmatprep.subr.bf16.mxu1 %v953_v38 }
  0x27   :  { %844 = vmatpush3.bf16.msra.mxu0 %v925_v40 }
  0x28   :  { %845 = vmatprep.subr.bf16.mxu0 %v926_v41 }
  0x2b   :  { %846 = vmatpush3.bf16.msra.mxu0 %v927_v42 }
  0x2c   :  { %847 = vmatprep.subr.bf16.mxu0 %v928_v43  ;;  %871 = vmatmul.mubr.msk.bf16.vlgmr.msra.gmra.mxu1 %vm463_vm1, %v942_v50 }
  0x2d   :  { %878 = vmatprep.mubr.msk.bf16.mxu1 %vm954_vm0, %v953_v38  ;;  %875 = vmatpush3.bf16.msra.mxu1 %v943_v57 }
  0x2e   :  { %876 = vmatprep.subr.bf16.mxu1 %v953_v38 }
  0x2f   :  { %848 = vmatpush3.bf16.msra.mxu0 %v929_v44 }
  0x30   :  { %849 = vmatprep.subr.bf16.mxu0 %v930_v45 }
  0x31   :  { %877 = vmatpush3.bf16.msra.mxu1 %v944_v58 }
  0x33   :  { %850 = vmatpush3.bf16.msra.mxu0 %v931_v46 }
  0x34   :  { %851 = vmatprep.subr.bf16.mxu0 %v932_v47 }
  0x37   :  { %852 = vmatpush3.bf16.msra.mxu0 %v933_v51  ;;  %v793_v51 = vld [vmem:[%s1177_s4] ss:$0 sm:$0xff] }
  0x38   :  { %853 = vmatprep.subr.bf16.mxu0 %v934_v52 }
  0x3b   :  { %854 = vmatpush3.bf16.msra.mxu0 %v935_v53 }
  0x3c   :  { %855 = vmatprep.subr.bf16.mxu0 %v936_v54 }
  0x3f   :  { %856 = vmatpush3.bf16.msra.mxu0 %v937_v55 }
  0x42   :  { %582 = vmatmul.mubr.bf16.vlgmr.msra.gmra.mxu0 %v939_v56 }
  0xe2   :  { %v813_v62 = vpop.f32.mrf.mxu0 }
  0xe4   :  { %v835_v59 = vpop.f32.mrf.mxu1  ;;  %v814_v1 = vpop.f32.mrf.mxu0 }
  0xe5   :  { %v815_v6 = vadd.f32 %v814_v1, %v813_v62 }
  0xe6   :  { %v836_v60 = vpop.f32.mrf.mxu1  ;;  %v816_v4 = vpop.f32.mrf.mxu0 }
  0xe7   :  { %v502_v9 = vadd.f32 %v815_v6, %v735_v7  ;;  %v837_v10 = vadd.f32 %v836_v60, %v835_v59 }
  0xe8   :  { %v838_v61 = vpop.f32.mrf.mxu1  ;;  %v817_v8 = vpop.f32.mrf.mxu0 }
  0xe9   :  { %v818_v11 = vadd.f32 %v817_v8, %v816_v4  ;;  %v543_v14 = vadd.f32 %v837_v10, %v502_v9 }
  0xea   :  { %v839_v63 = vpop.f32.mrf.mxu1 }
  0xeb   :  { %v505_v15 = vadd.f32 %v818_v11, %v735_v7  ;;  %v840_v16 = vadd.f32 %v839_v63, %v838_v61 }
  0xec   :  { %v624_v0 = vpop.f32.mrf.mxu1 }
  0xed   :  { %v546_v21 = vadd.f32 %v840_v16, %v505_v15 }
  0xee   :  { %v872_v2 = vpop.f32.mrf.mxu1 }
  0xf0   :  { %v627_v3 = vpop.f32.mrf.mxu1 }
  0xf2   :  { %v873_v5 = vpop.f32.mrf.mxu1 }
 0x102   :  { %v857_v12 = vpop.f32.mrf.mxu0 }
 0x104   :  { %v858_v13 = vpop.f32.mrf.mxu0 }
 0x105   :  { %v859_v17 = vadd.f32 %v858_v13, %v857_v12 }
 0x106   :  { %v860_v18 = vpop.f32.mrf.mxu0 }
 0x107   :  { %v584_v19 = vadd.f32 %v859_v17, %v543_v14 }
 0x108   :  { %v861_v20 = vpop.f32.mrf.mxu0 }
 0x109   :  { %v625_v22 = vadd.f32 %v624_v0, %v584_v19  ;;  %v862_v23 = vadd.f32 %v861_v20, %v860_v18 }
 0x10b   :  { %v633_v24 = vmin.f32 %v625_v22, 20.0  ;;  %v587_v25 = vadd.f32 %v862_v23, %v546_v21  ;;  %vm631_vm4 = vcmp.gt.f32.partialorder %v625_v22, 20.0 }
 0x10d   :  { %v635_v26 = vmul.f32 1.442695, %v633_v24  ;;  %v628_v27 = vadd.f32 %v627_v3, %v587_v25 }
 0x10f   :  { %945 = vpow2.f32 %v635_v26  ;;  %v634_v28 = vmin.f32 %v628_v27, 20.0  ;;  %vm632_vm5 = vcmp.gt.f32.partialorder %v628_v27, 20.0 }
 0x111   :  { %v637_v29 = vmul.f32 1.442695, %v634_v28 }
 0x113   :  { %947 = vpow2.f32 %v637_v29 }
 0x11c   :  { %v946_v30 = vpop.eup %945 }
 0x11d   :  { %v639_v31 = vadd.f32 1.0, %v946_v30  ;;  %v642_v34 = vmul.f32 -0.5, %v946_v30  ;;  %v645_v38 = vand.u32 2147483647, %v946_v30 }
 0x11f   :  { %949 = vlog2.f32 %v639_v31  ;;  %v643_v36 = vadd.f32 1.0, %v642_v34  ;;  %vm646_vm2 = vcmp.lt.f32.partialorder %v645_v38, 0.0004427343 }
 0x120   :  { %v948_v32 = vpop.eup %947 }
 0x121   :  { %v648_v33 = vadd.f32 1.0, %v948_v32  ;;  %v651_v35 = vmul.f32 -0.5, %v948_v32  ;;  %v654_v41 = vand.u32 2147483647, %v948_v32  ;;  %v644_v42 = vmul.f32 %v946_v30, %v643_v36 }
 0x123   :  { %951 = vlog2.f32 %v648_v33  ;;  %v652_v40 = vadd.f32 1.0, %v651_v35  ;;  %vm655_vm3 = vcmp.lt.f32.partialorder %v654_v41, 0.0004427343 }
 0x125   :  { %v653_v46 = vmul.f32 %v948_v32, %v652_v40 }
 0x12c   :  { %v950_v37 = vpop.eup %949 }
 0x12d   :  { %v641_v39 = vmul.f32 0.6931472, %v950_v37 }
 0x12f   :  { %v647_v44 = vsel %vm646_vm2, %v644_v42, %v641_v39 }
 0x130   :  { %v952_v43 = vpop.eup %951  ;;  %v657_v48 = vsel %vm631_vm4, %v625_v22, %v647_v44 }
 0x131   :  { %v650_v45 = vmul.f32 0.6931472, %v952_v43 }
 0x133   :  { %v656_v47 = vsel %vm655_vm3, %v653_v46, %v650_v45 }
 0x134   :  { %v658_v49 = vsel %vm632_vm5, %v628_v27, %v656_v47 }
 0x135   :  { %v659_v50 = vpack.c.bf16 %v658_v49, %v657_v48 }
 0x137   :  { %879 = vmatmul.mubr.msk.bf16.vlgmr.msra.gmra.mxu1 %vm683_vm6, %v659_v50 }
 0x1f7   :  { %v721_v52 = vpop.f32.mrf.mxu1 }
 0x1f8   :  { %v722_v53 = vadd.f32 %v793_v51, %v721_v52 }
 0x1f9   :  { %v880_v54 = vpop.f32.mrf.mxu1 }
 0x1fa   :  { %729 = vst.msk [vmem:[%s1178_s5] sm:$0xff] %vm728_vm7, %v722_v53 }
 0x1fb   :  { %v724_v55 = vpop.f32.mrf.mxu1 }
 0x1fc   :  { %v725_v56 = vadd.f32 %v793_v51, %v724_v55 }
 0x1fd   :  { %v881_v57 = vpop.f32.mrf.mxu1 }
 0x1fe   :  { %730 = vst.msk [vmem:[%s1178_s5 + $0x8] sm:$0xff] %vm728_vm7, %v725_v56 }

</bundles_post_ra>
